<compile_context>
chip_gen: v6e
topology: v6e:2x2x1
jax: 0.10.0
libtpu: 0.0.40
codegen_flags: <defaults>
</compile_context>

<pallas_src>
import jax
import jax.numpy as jnp
from jax import lax
from jax.experimental import pallas as pl
from jax.experimental.pallas import tpu as pltpu


# ---------------------------------------------------------------------------
# Kernel 1: projection scores  s = sigmoid((X @ w^T + b) / 100)
# Emitted lane-dense as a (1, TN) row: contract D of w [1,D] with D of the
# X tile [TN,D] (same dimension numbers as Q @ K^T in flash attention), so the
# store is a full unmasked vst and the downstream top_k needs no reshape.
# Bias scalar lives in SMEM.
# ---------------------------------------------------------------------------
def _score_kernel(x_ref, w_ref, b_ref, s_ref):
    x = x_ref[...].astype(jnp.float32)                          # [TN, D]
    w = w_ref[...].astype(jnp.float32)                          # [1,  D]
    logits = lax.dot_general(w, x, (((1,), (1,)), ((), ())),
                             preferred_element_type=jnp.float32)  # [1, TN]
    s_ref[...] = jax.nn.sigmoid((logits + b_ref[0, 0]) * 0.01)


# ---------------------------------------------------------------------------
# Kernel 2: batched row/column gather, one TR-row tile per grid step.
#   * issue all 2*TR row DMAs (X rows first, then A rows) before any wait,
#   * wait X rows -> new_X tile = X_rows * values (scaled at write time; the
#     multiply overlaps the still-in-flight A row DMAs),
#   * wait A rows -> stream new_A tile = A_rows @ one_hot(idx), with the
#     one-hot selector generated per N-chunk (exact in f32) instead of being
#     materialised as an (N, K) scratch.
# Each tile touches only its own output blocks and rebuilds its scratch, so
# the grid axis is safe to shard across TensorCores.
# ---------------------------------------------------------------------------
def _make_gather_kernel(tr, K, N, n_chunk):
    def kernel(idx_sm,                    # SMEM [K] int32 (scalar prefetch)
               a_hbm, x_hbm,              # HBM  [N,N], [N,D]  (pl.ANY)
               idxv_ref, val_ref,         # VMEM [1,K] int32, [TR,1] f32
               newa_ref, newx_ref,        # VMEM outputs [TR,K], [TR,D]
               a_stage, x_stage, sems):   # scratch row staging + DMA sems
        base = pl.program_id(0) * tr

        # Issue every row DMA for this tile before waiting on any of them.
        x_copies = []
        for r in range(tr):
            row = jnp.minimum(base + r, K - 1)          # clamp tail overhang
            src = idx_sm[row]
            cp = pltpu.make_async_copy(x_hbm.at[pl.ds(src, 1), :],
                                       x_stage.at[pl.ds(r, 1), :],
                                       sems.at[1])
            cp.start()
            x_copies.append(cp)
        a_copies = []
        for r in range(tr):
            row = jnp.minimum(base + r, K - 1)
            src = idx_sm[row]
            cp = pltpu.make_async_copy(a_hbm.at[pl.ds(src, 1), :],
                                       a_stage.at[pl.ds(r, 1), :],
                                       sems.at[0])
            cp.start()
            a_copies.append(cp)

        # new_X tile: scale by the top-k values at write time (full-tile store).
        for cp in x_copies:
            cp.wait()
        newx_ref[...] = (x_stage[...].astype(jnp.float32) *
                         val_ref[...]).astype(newx_ref.dtype)

        # new_A tile: streamed one-hot column selection on the MXU.
        for cp in a_copies:
            cp.wait()
        ar = a_stage[...].astype(jnp.float32)            # [TR, N]
        idxv = idxv_ref[...]                             # [1, K] int32
        acc = jnp.zeros((tr, K), jnp.float32)
        n0 = 0
        while n0 < N:                                    # static chunk loop
            cs = min(n_chunk, N - n0)
            cols = lax.broadcasted_iota(jnp.int32, (cs, K), 0) + n0
            one_hot = (cols == idxv).astype(jnp.float32)   # exact selector
            acc = acc + jnp.dot(ar[:, n0:n0 + cs], one_hot,
                                preferred_element_type=jnp.float32)
            n0 += cs
        newa_ref[...] = acc.astype(newa_ref.dtype)

    return kernel


# ---------------------------------------------------------------------------
# Wrapper
# ---------------------------------------------------------------------------
def graph_pool(A, X, weight, bias, k):
    """Pallas implementation of GraphPool.forward(A, X) -> (new_A, new_X, idx)."""
    N = A.shape[0]
    D = X.shape[1]
    K = int(k * N)

    w2d = weight.reshape(1, D).astype(jnp.float32)
    b2d = bias.reshape(1, 1).astype(jnp.float32)

    # ---- scores: mem-bound read of X; D-aware row tile; (1, N) output ------
    budget = 8 * 1024 * 1024                      # bytes for 2x (tn, D) f32
    tn_cap = max(1, budget // (2 * 4 * D))
    tn = N if tn_cap >= N else max(128, (tn_cap // 128) * 128)
    scores = pl.pallas_call(
        _score_kernel,
        out_shape=jax.ShapeDtypeStruct((1, N), jnp.float32),
        grid=(pl.cdiv(N, tn),),
        in_specs=[
            pl.BlockSpec((tn, D), lambda i: (i, 0)),
            pl.BlockSpec((1, D), lambda i: (0, 0)),
            pl.BlockSpec(memory_space=pltpu.MemorySpace.SMEM),
        ],
        out_specs=pl.BlockSpec((1, tn), lambda i: (0, i)),
        compiler_params=pltpu.CompilerParams(dimension_semantics=("parallel",)),
    )(X, w2d, b2d)

    # ---- top-k: selection/sort glue kept in plain JAX ----------------------
    values, idx = lax.top_k(scores[0], K)
    idx = idx.astype(jnp.int32)

    # ---- batched DMA row gather + streamed column selection ----------------
    TR = min(K, 64)             # rows per tile (either == K or a multiple of 8)
    n_chunk = min(N, 512)       # one-hot streaming chunk along N
    grid_spec = pltpu.PrefetchScalarGridSpec(
        num_scalar_prefetch=1,                                 # idx -> SMEM
        grid=(pl.cdiv(K, TR),),
        in_specs=[
            pl.BlockSpec(memory_space=pl.ANY),                 # A stays in HBM
            pl.BlockSpec(memory_space=pl.ANY),                 # X stays in HBM
            pl.BlockSpec((1, K), lambda t, idx_ref: (0, 0)),   # idx lane vector
            pl.BlockSpec((TR, 1), lambda t, idx_ref: (t, 0)),  # top-k values
        ],
        out_specs=(
            pl.BlockSpec((TR, K), lambda t, idx_ref: (t, 0)),
            pl.BlockSpec((TR, D), lambda t, idx_ref: (t, 0)),
        ),
        scratch_shapes=[
            pltpu.VMEM((TR, N), A.dtype),        # A rows for the current tile
            pltpu.VMEM((TR, D), X.dtype),        # X rows for the current tile
            pltpu.SemaphoreType.DMA((2,)),       # [A-row stream, X-row stream]
        ],
    )
    new_A, new_X = pl.pallas_call(
        _make_gather_kernel(TR, K, N, n_chunk),
        out_shape=(
            jax.ShapeDtypeStruct((K, K), A.dtype),
            jax.ShapeDtypeStruct((K, D), X.dtype),
        ),
        grid_spec=grid_spec,
        compiler_params=pltpu.CompilerParams(dimension_semantics=("parallel",)),
    )(idx, A, X, idx.reshape(1, K), values.reshape(K, 1).astype(jnp.float32))

    return new_A, new_X, idx


# Pure-JAX reference (mirrors the PyTorch module) for verification.
def graph_pool_ref(A, X, weight, bias, k):
    scores = jax.nn.sigmoid(
        (X @ weight.reshape(-1, 1) + bias.reshape(1, 1))[:, 0] / 100.0)
    K = int(k * A.shape[0])
    values, idx = lax.top_k(scores, K)
    new_X = X[idx, :] * values[:, None]
    new_A = A[idx, :][:, idx]
    return new_A, new_X, idx


if __name__ == "__main__":
    import numpy as np

    key = jax.random.PRNGKey(0)
    k_a, k_x, k_w, k_b = jax.random.split(key, 4)

    N, D = 16, 32          # num_nodes, in_dim
    pool_ratio = 0.5       # k in GraphPool(k, in_dim)

    A = jax.random.uniform(k_a, (N, N), dtype=jnp.float32)
    X = jax.random.normal(k_x, (N, D), dtype=jnp.float32)

    # Deterministic nn.Linear(in_dim, 1) parameters (synthetic init).
    bound = 1.0 / np.sqrt(D)
    weight = jax.random.uniform(k_w, (1, D), minval=-bound, maxval=bound,
                                dtype=jnp.float32)
    bias = jax.random.uniform(k_b, (1,), minval=-bound, maxval=bound,
                              dtype=jnp.float32)

    new_A, new_X, idx = graph_pool(A, X, weight, bias, pool_ratio)
    jax.block_until_ready((new_A, new_X, idx))

    ref_A, ref_X, ref_idx = graph_pool_ref(A, X, weight, bias, pool_ratio)
    K = int(pool_ratio * N)
    assert new_A.shape == (K, K)
    assert new_X.shape == (K, D)
    np.testing.assert_array_equal(np.asarray(idx), np.asarray(ref_idx))
    np.testing.assert_allclose(np.asarray(new_A), np.asarray(ref_A),
                               rtol=1e-5, atol=1e-5)
    np.testing.assert_allclose(np.asarray(new_X), np.asarray(ref_X),
                               rtol=1e-5, atol=1e-5)

    print("KERNEL_OK")
</pallas_src>

<mosaic_0001>
module attributes {stable_mosaic.version = 11 : i64} {
  func.func @_score_kernel(%arg0: i32, %arg1: memref<16x32xf32, #tpu.memory_space<vmem>>, %arg2: memref<1x32xf32, #tpu.memory_space<vmem>>, %arg3: memref<1x1xf32, #tpu.memory_space<smem>>, %arg4: memref<1x16xf32, #tpu.memory_space<vmem>>) attributes {dimension_semantics = [#tpu.dimension_semantics<parallel>], iteration_bounds = array<i64: 1>, scalar_prefetch = 0 : i64, scratch_operands = 0 : i64, tpu.core_type = #tpu.core_type<tc>, window_params = [{transform_indices = @transform_0, window_bounds = array<i64: 16, 32>}, {pipeline_mode = #tpu.pipeline_mode<synchronous>, transform_indices = @transform_1, window_bounds = array<i64: 1, 32>}, {transform_indices = @transform_2, window_bounds = array<i64: 1, 1>}, {transform_indices = @transform_3, window_bounds = array<i64: 1, 16>}]} {
    %c0 = arith.constant 0 : index
    %c0_0 = arith.constant 0 : index
    %0 = vector.load %arg1[%c0, %c0_0] : memref<16x32xf32, #tpu.memory_space<vmem>>, vector<16x32xf32>
    %c0_1 = arith.constant 0 : index
    %c0_2 = arith.constant 0 : index
    %1 = vector.load %arg2[%c0_1, %c0_2] : memref<1x32xf32, #tpu.memory_space<vmem>>, vector<1x32xf32>
    %cst = arith.constant dense<0.000000e+00> : vector<1x16xf32>
    %2 = tpu.matmul %1, %0, %cst {dimension_numbers = #tpu.dot_dimension_numbers<[1], [1], [0], [0], [0, 0, 1, 0], [], []>} : vector<1x32xf32>, vector<16x32xf32>, vector<1x16xf32> -> vector<1x16xf32>
    %c0_3 = arith.constant 0 : index
    %c0_4 = arith.constant 0 : index
    %3 = memref.load %arg3[%c0_3, %c0_4] : memref<1x1xf32, #tpu.memory_space<smem>>
    %4 = vector.broadcast %3 : f32 to vector<1x16xf32>
    %5 = arith.addf %2, %4 : vector<1x16xf32>
    %cst_5 = arith.constant 0.00999999977 : f32
    %6 = vector.broadcast %cst_5 : f32 to vector<1x16xf32>
    %7 = arith.mulf %5, %6 : vector<1x16xf32>
    %8 = arith.negf %7 : vector<1x16xf32>
    %9 = math.exp %8 : vector<1x16xf32>
    %cst_6 = arith.constant 1.000000e+00 : f32
    %10 = vector.broadcast %cst_6 : f32 to vector<1x16xf32>
    %11 = arith.addf %10, %9 : vector<1x16xf32>
    %12 = arith.divf %10, %11 : vector<1x16xf32>
    %c0_7 = arith.constant 0 : index
    %c0_8 = arith.constant 0 : index
    %13 = vector.load %arg4[%c0_7, %c0_8] : memref<1x16xf32, #tpu.memory_space<vmem>>, vector<1x16xf32>
    tpu.vector_store %arg4[%c0_7, %c0_8], %12 {strides = array<i32>} : memref<1x16xf32, #tpu.memory_space<vmem>>, vector<1x16xf32>,
    return
  }
  func.func @transform_0(%arg0: i32) -> (i32, i32) {
    %c0_i32 = arith.constant 0 : i32
    %c0_i32_0 = arith.constant 0 : i32
    return %arg0, %c0_i32 : i32, i32
  }
  func.func @transform_1(%arg0: i32) -> (i32, i32) {
    %c0_i32 = arith.constant 0 : i32
    %c0_i32_0 = arith.constant 0 : i32
    %c0_i32_1 = arith.constant 0 : i32
    return %c0_i32, %c0_i32_0 : i32, i32
  }
  func.func @transform_2(%arg0: i32) -> (i32, i32) {
    %c0_i32 = arith.constant 0 : i32
    %c0_i32_0 = arith.constant 0 : i32
    %c0_i32_1 = arith.constant 0 : i32
    return %c0_i32, %c0_i32_0 : i32, i32
  }
  func.func @transform_3(%arg0: i32) -> (i32, i32) {
    %c0_i32 = arith.constant 0 : i32
    %c0_i32_0 = arith.constant 0 : i32
    return %c0_i32, %arg0 : i32, i32
  }
}

</mosaic_0001>

<bundles_post_ra>
// kernel: tpu_custom_call.1
= control target key start
LH: loop header
LB: loop body
LE: loop exit
PB: predicated region body
PF: predicated region fallthrough
CT: control target
= control target key end

     0   :  { %9 = vsyncpa [#allocation4], 0  ;;  %s245_s0 = inlined_call_operand.hbm [shape: f32[16,32], index: 0, kind: input, shape index: {}]   ;;  %s246_s1 = inlined_call_operand.vmem [shape: f32[1,32], index: 1, kind: input, shape index: {}]   ;;  %s247_s2 = inlined_call_operand.<no memory space> [shape: f32[1,1], index: 2, kind: input, shape index: {}]   ;;  %s248_s3 = inlined_call_operand.hbm [shape: f32[1,16], index: 3, kind: output, shape index: {}]  }
   0x1   :  { %10 = vsyncpa [#allocation5], 0  ;;  %s207_s12 = smov [#allocation3]  }
   0x2   :  { %s16_s13 = sshll.u32 %s207_s12, 4  ;;  %s17_s13 = int_to_ptr.vmem [resolvable:$true] %s16_s13 }
   0x3   :  { %s171_s14 = scalar_lea.vmem %s17_s13, 256  ;;  %p176_p1 = scmp.lt.s32.totalorder %s17_s13, %s17_s13 }
   0x4   :  { %p172_p0 = scmp.ne.s32.totalorder %s17_s13, %s171_s14  ;;  %p177_p2 = scmp.lt.s32.totalorder %s171_s14, %s171_s14 }
   0x6   :  { %p178_p3 = por %p177_p2, %p176_p1 }
   0x8   :  { %p179_p4 = pnand %p178_p3, %p172_p0 }
   0xa   :  { %182 = shalt.err (!%p179_p4)
}
   0xb   :  { %s208_s15 = smov 128   ;;  %s209_s16 = smov 8  }
   0xc   :  { %22 = dma.hbm_to_vmem [thread:$0]  %s245_s0, 256, %s17_s13, [#allocation4], %s208_s15, %s208_s15, %s209_s16  }
   0xd   :  { %203 = dma.done.wait [#allocation4], 256  }
   0xe   :  { %204 = vsyncadd [#allocation4], 4294967040  ;;  %v210_v0 = vmov 0.0   ;;  %vm211_vm0 = vmmov 0   ;;  %vm35_vm1 = vcmask 261120   ;;  %v31_v1 = vld [vmem:[#allocation3 + $0x8] sm:$0xff]  ;;  %v34_v4 = vstv %s247_s2 }
   0xf   :  { %146 = vmatprep.subr.mxu0 %v210_v0  ;;  %150 = vmatprep.mubr.msk.f32.mxu0 %vm211_vm0, %v210_v0  ;;  %v30_v2 = vld [vmem:[#allocation3] sm:$0xff]  ;;  %s212_s0 = smov [#allocation6]   ;;  %vm122_vm2 = vcmask 122880  }
  0x10   :  { %147 = vmatpush3.xpose.msk.msra.mxu0 %vm35_vm1, %v31_v1  ;;  %v32_v3 = vld [vmem:[%s246_s1] sm:$0x1]  ;;  %s130_s23 = sshll.u32 %s212_s0, 4  ;;  %s131_s23 = int_to_ptr.vmem [resolvable:$true] %s130_s23 }
  0x11   :  { %148 = vmatprep.subr.mxu0 %v210_v0  ;;  %s183_s1 = scalar_lea.vmem %s131_s23, 16  ;;  %s187_s24 = scalar_lea.vmem %s131_s23, 32 }
  0x12   :  { %p184_p5 = scmp.ne.s32.totalorder %s131_s23, %s183_s1  ;;  %p188_p6 = scmp.lt.s32.totalorder %s131_s23, %s131_s23 }
  0x13   :  { %p189_p7 = scmp.lt.s32.totalorder %s187_s24, %s183_s1 }
  0x14   :  { %149 = vmatpush3.xpose.msk.msra.mxu0 %vm35_vm1, %v30_v2 }
  0x15   :  { %p190_p8 = por %p189_p7, %p188_p6 }
  0x17   :  { %151 = vmatmul.mubr.msk.f32.vlgmr.msra.gmra.mxu0 %vm35_vm1, %v32_v3  ;;  %p191_p9 = pnand %p190_p8, %p184_p5 }
  0xd7   :  { %v111_v5 = vpop.f32.mrf.mxu0 }
  0xd8   :  { %v112_v6 = vadd.f32 %v111_v5, %v34_v4 }
  0xd9   :  { %v152_v7 = vpop.f32.mrf.mxu0 }
  0xda   :  { %v142_v8 = vmul.f32 -0.01, %v112_v6 }
  0xdc   :  { %v117_v9 = vmul.f32 1.442695, %v142_v8 }
  0xde   :  { %159 = vpow2.f32 %v117_v9 }
  0xeb   :  { %v160_v10 = vpop.eup %159 }
  0xec   :  { %v119_v11 = vadd.f32 1.0, %v160_v10 }
  0xee   :  { %161 = vrcp.f32 %v119_v11 }
  0xfb   :  { %v162_v12 = vpop.eup %161 }
  0xfc   :  { %123 = vst.msk [vmem:[#allocation6] sm:$0x1] %vm122_vm2, %v162_v12 }
  0xfd   :  { %194 = shalt.err (!%p191_p9)
}
  0xfe   :  { %133 = dma.vmem_to_hbm [thread:$0]  %s131_s23, 16, %s248_s3, [#allocation5]  }
  0xff   :  { %205 = dma.done.wait [#allocation5], 16  }
 0x100   :  { %206 = vsyncadd [#allocation5], 4294967280 }
 0x101   :  { %137 = vsyncpa [#allocation4], 1 }
 0x102   :  { %138 = vsyncpa [#allocation5], 1 }

</bundles_post_ra>
